<compile_context>
chip_gen: v5e
topology: v5e:2x2
jax: 0.10.0
libtpu: 0.0.40
codegen_flags: <defaults>
</compile_context>

<pallas_src>
import jax
import jax.numpy as jnp
from jax import lax
from jax.experimental import pallas as pl
from jax.experimental.pallas import tpu as pltpu


# Finite "-inf" for the online-softmax running max: keeps exp(s - m_new) well-defined
# (exactly 0 at masked positions) even for chunks whose rows are fully masked.
_NEG_INIT = float(jnp.finfo(jnp.float32).min)


# --------------------------------------------------------------------------
# VMEM budget & tile selection
# --------------------------------------------------------------------------
def _vmem_capacity_bytes():
    """Physical VMEM capacity; conservative (v7x: 64 MiB) fallback if the query fails."""
    try:
        cap = getattr(pltpu.get_tpu_info(), "vmem_capacity_bytes", None)
        if cap:
            return int(cap)
    except Exception:
        pass
    return 64 * 1024 * 1024


def _vmem_limit_bytes():
    # ~38 MiB on v7x (64 MiB physical), ~76 MiB on v5e/v6e (128 MiB physical);
    # leaves headroom for Mosaic internal scratch.
    return int(_vmem_capacity_bytes() * 0.6)


def _pick_tiles(B, S, H, x_itemsize, *, f32_slabs, fixed_bytes, budget):
    """VMEM-budget-aware (TB, TS) selection.

    Cost model per grid step (bytes):
      2 * TB*TS*(H*x_itemsize + 4)   # double-buffered x block + mask block
      + f32_slabs * TB*TS*H*4        # live f32 intermediates (attention: h / LN / p@x)
      + fixed_bytes                  # resident weights, output block, scratch, slack
    Picks the largest TB*TS that fits (fewest grid steps / best DMA overlap).
    """
    tbs = [tb for tb in (32, 16, 8) if B % tb == 0] or [B]
    tss = [ts for ts in (1024, 512, 256, 128) if S % ts == 0] or [S]
    per_row = 2 * (H * x_itemsize + 4) + f32_slabs * H * 4
    best = None
    for tb in tbs:
        for ts in tss:
            if per_row * tb * ts + fixed_bytes <= budget:
                if best is None or tb * ts > best[0] * best[1]:
                    best = (tb, ts)
    if best is None:
        # Smallest legal block; may still be tight at extreme H but never silently huge.
        best = (min(tbs), min(tss))
    return best


# --------------------------------------------------------------------------
# MeanPooling:  mean_emb = sum(x * mask, axis=1) / clamp(sum(mask), 1e-9)
# --------------------------------------------------------------------------
def _meanpool_kernel(x_ref, mask_ref, o_ref, cnt_ref):
    si = pl.program_id(1)

    @pl.when(si == 0)
    def _init():
        o_ref[...] = jnp.zeros_like(o_ref)
        cnt_ref[...] = jnp.zeros_like(cnt_ref)

    x = x_ref[...]                                  # (TB, TS, H) native dtype
    m = mask_ref[...].astype(x.dtype)               # (TB, TS)

    # Masked sum as a batched (1,TS)x(TS,H) matmul on the (otherwise idle) MXU with f32
    # accumulation -> almost no VALU work on the HBM-bound path (matters on v7x).
    o_ref[...] += jnp.einsum(
        "bqs,bsh->bqh", m[:, None, :], x, preferred_element_type=jnp.float32
    )[:, 0, :]
    cnt_ref[...] += jnp.sum(mask_ref[...].astype(jnp.float32), axis=1, keepdims=True)

    @pl.when(si == pl.num_programs(1) - 1)
    def _finalize():
        o_ref[...] = o_ref[...] / jnp.maximum(cnt_ref[...], 1e-9)


def mean_pooling(x, mask, *, batch_block=None, seq_block=None):
    B, S, H = x.shape
    limit = _vmem_limit_bytes()
    budget = int(limit * 0.85) - 2 * 1024 * 1024   # reserve for out block / cnt / misc
    TB, TS = _pick_tiles(B, S, H, jnp.dtype(x.dtype).itemsize,
                         f32_slabs=0, fixed_bytes=0, budget=budget)
    if batch_block is not None:
        TB = batch_block
    if seq_block is not None:
        TS = seq_block
    assert B % TB == 0 and S % TS == 0
    grid = (B // TB, S // TS)

    return pl.pallas_call(
        _meanpool_kernel,
        # float32 output: torch promotes (half * mask.float()) to float32.
        out_shape=jax.ShapeDtypeStruct((B, H), jnp.float32),
        grid=grid,
        in_specs=[
            pl.BlockSpec((TB, TS, H), lambda b, s: (b, s, 0)),   # x
            pl.BlockSpec((TB, TS), lambda b, s: (b, s)),         # mask
        ],
        out_specs=pl.BlockSpec((TB, H), lambda b, s: (b, 0)),    # resident f32 accumulator
        scratch_shapes=[
            pltpu.VMEM((TB, 1), jnp.float32),                    # running mask count
        ],
        compiler_params=pltpu.CompilerParams(
            dimension_semantics=("parallel", "arbitrary"),
            vmem_limit_bytes=limit,
        ),
    )(x, mask)


# --------------------------------------------------------------------------
# AttentionPooling (flash-style online softmax over sequence chunks):
#   score = Linear2(GELU(LayerNorm(Linear1(x))))     (per-token scalar)
#   score[mask == 0] = -inf ; w = softmax(score, axis=1)
#   out = sum(w * x, axis=1)
# --------------------------------------------------------------------------
def _attnpool_kernel(x_ref, mask_ref, w1_ref, b1_ref, g_ref, be_ref, w2_ref,
                     b2_ref, o_ref, m_scr, l_scr, acc_scr):
    si = pl.program_id(1)

    @pl.when(si == 0)
    def _init():
        m_scr[...] = jnp.full_like(m_scr, _NEG_INIT)
        l_scr[...] = jnp.zeros_like(l_scr)
        acc_scr[...] = jnp.zeros_like(acc_scr)

    x = x_ref[...]                                   # (TB, TS, H) native dtype
    TB, TS, H = x.shape

    # ---- per-token score: Linear1 -> LayerNorm -> GELU -> Linear2 ----
    # W1 was cast to x.dtype on the wrapper side -> native MXU path; f32 accumulation.
    h = jnp.dot(x.reshape(TB * TS, H), w1_ref[...],
                preferred_element_type=jnp.float32).reshape(TB, TS, H)
    h = h + b1_ref[...].astype(jnp.float32)

    # LayerNorm (eps=1e-5, nn.LayerNorm default) with one-pass variance E[h^2]-mu^2.
    mu = jnp.mean(h, axis=-1, keepdims=True)
    var = jnp.mean(h * h, axis=-1, keepdims=True) - mu * mu
    h = (h - mu) * lax.rsqrt(var + 1e-5)
    h = h * g_ref[...].astype(jnp.float32) + be_ref[...].astype(jnp.float32)

    # Exact (erf) GELU, matching nn.GELU() default semantics.
    h = jax.nn.gelu(h, approximate=False)

    # Linear2 has N=1: VPU multiply + lane reduce keeps the MXU free for the HxH matmul.
    s = jnp.sum(h * w2_ref[...].astype(jnp.float32), axis=-1) + b2_ref[0, 0]   # (TB, TS)

    # ---- masked online softmax over the sequence axis ----
    s = jnp.where(mask_ref[...] != 0, s, -jnp.inf)

    m_old = m_scr[...]                                            # (TB, 1), finite
    m_new = jnp.maximum(m_old, jnp.max(s, axis=-1, keepdims=True))
    # m_new stays finite even for fully-masked chunks (m_old >= _NEG_INIT), so
    # exp(s - m_new) is exactly 0 at masked positions -> no extra where / alpha guard.
    alpha = jnp.exp(m_old - m_new)                                # (TB, 1)
    p = jnp.exp(s - m_new)                                        # (TB, TS)

    l_scr[...] = alpha * l_scr[...] + jnp.sum(p, axis=-1, keepdims=True)
    # Weighted sum on the MXU (batched (1,TS)x(TS,H), f32 accumulate) instead of a
    # broadcast multiply + reduce over the full (TB,TS,H) slab on the VALU.
    pv = jnp.einsum("bqs,bsh->bqh", p.astype(x.dtype)[:, None, :], x,
                    preferred_element_type=jnp.float32)[:, 0, :]
    acc_scr[...] = alpha * acc_scr[...] + pv
    m_scr[...] = m_new

    @pl.when(si == pl.num_programs(1) - 1)
    def _finalize():
        # Fully-masked rows give 0/0 = NaN, matching torch.softmax of all -inf.
        o_ref[...] = (acc_scr[...] / l_scr[...]).astype(o_ref.dtype)


def attention_pooling(x, mask, params, *, batch_block=None, seq_block=None):
    B, S, H = x.shape
    limit = _vmem_limit_bytes()
    x_itemsize = jnp.dtype(x.dtype).itemsize
    # Resident weights (single VMEM copy) + small vectors + output/acc blocks + slack.
    fixed = H * H * x_itemsize + 8 * H * 4 + 4 * 1024 * 1024
    budget = int(limit * 0.85)
    TB, TS = _pick_tiles(B, S, H, x_itemsize,
                         f32_slabs=3, fixed_bytes=fixed, budget=budget)
    if batch_block is not None:
        TB = batch_block
    if seq_block is not None:
        TS = seq_block
    assert B % TB == 0 and S % TS == 0
    grid = (B // TB, S // TS)

    w1 = params["w1"].astype(x.dtype)             # native MXU path (bf16 in production)
    b1 = params["b1"].astype(jnp.float32)
    gamma = params["gamma"].astype(jnp.float32)
    beta = params["beta"].astype(jnp.float32)
    w2_row = params["w2"].reshape(1, H).astype(jnp.float32)   # (H,1) -> (1,H) VPU row
    b2 = params["b2"].reshape(1, 1).astype(jnp.float32)       # scalar -> SMEM

    return pl.pallas_call(
        _attnpool_kernel,
        # float32 output: torch applies .float() to the attention weights -> f32 result.
        out_shape=jax.ShapeDtypeStruct((B, H), jnp.float32),
        grid=grid,
        in_specs=[
            pl.BlockSpec((TB, TS, H), lambda b, s: (b, s, 0)),        # x (pipelined)
            pl.BlockSpec((TB, TS), lambda b, s: (b, s)),              # mask (pipelined)
            pl.BlockSpec(memory_space=pltpu.MemorySpace.VMEM),        # W1: single resident copy
            pl.BlockSpec(memory_space=pltpu.MemorySpace.VMEM),        # b1
            pl.BlockSpec(memory_space=pltpu.MemorySpace.VMEM),        # LN gamma
            pl.BlockSpec(memory_space=pltpu.MemorySpace.VMEM),        # LN beta
            pl.BlockSpec(memory_space=pltpu.MemorySpace.VMEM),        # W2 row
            pl.BlockSpec(memory_space=pltpu.MemorySpace.SMEM),        # b2 scalar
        ],
        out_specs=pl.BlockSpec((TB, H), lambda b, s: (b, 0)),
        scratch_shapes=[
            pltpu.VMEM((TB, 1), jnp.float32),   # running max
            pltpu.VMEM((TB, 1), jnp.float32),   # running softmax denominator
            pltpu.VMEM((TB, H), jnp.float32),   # running weighted sum
        ],
        compiler_params=pltpu.CompilerParams(
            dimension_semantics=("parallel", "arbitrary"),
            vmem_limit_bytes=limit,
        ),
    )(x, mask, w1, b1, gamma, beta, w2_row, b2)


# --------------------------------------------------------------------------
# Module-level wrapper mirroring the PyTorch config dispatch
# --------------------------------------------------------------------------
class PoolingConfig:
    def __init__(self, name="Meanpool", MeanPooling=False, AttentionPooling=False):
        self.name = name
        self.MeanPooling = MeanPooling
        self.AttentionPooling = AttentionPooling


class Pooling:
    def __init__(self, config, hidden_size, key):
        self.config = config
        self.params = None
        if config.AttentionPooling or config.name == "Attention":
            # deterministic synthetic init of the attention head
            # (nn.Linear(H,H), nn.LayerNorm(H), nn.GELU(), nn.Linear(H,1))
            k1, k2, k3, k4 = jax.random.split(key, 4)
            scale = 1.0 / float(hidden_size) ** 0.5
            self.params = dict(
                w1=jax.random.uniform(k1, (hidden_size, hidden_size), jnp.float32,
                                      -scale, scale),
                b1=jax.random.uniform(k2, (1, hidden_size), jnp.float32, -scale, scale),
                gamma=jnp.ones((1, hidden_size), jnp.float32),
                beta=jnp.zeros((1, hidden_size), jnp.float32),
                w2=jax.random.uniform(k3, (hidden_size, 1), jnp.float32, -scale, scale),
                b2=jax.random.uniform(k4, (1, 1), jnp.float32, -scale, scale),
            )

    def __call__(self, last_hidden_state, attention_mask, **tile_overrides):
        if self.config.MeanPooling:
            return mean_pooling(last_hidden_state, attention_mask, **tile_overrides)
        elif self.config.AttentionPooling:
            return attention_pooling(last_hidden_state, attention_mask, self.params,
                                     **tile_overrides)
        else:
            # CLS pooling fallback: last_hidden_state[:, 0, :]
            return last_hidden_state[:, 0, :]


# --------------------------------------------------------------------------
# Pure-JAX references for verification
# --------------------------------------------------------------------------
def _mean_pool_ref(x, mask):
    me = mask.astype(jnp.float32)[:, :, None]
    return jnp.sum(x * me, axis=1) / jnp.maximum(jnp.sum(me, axis=1), 1e-9)


def _attn_pool_ref(x, mask, p):
    h = x @ p["w1"] + p["b1"]
    mu = jnp.mean(h, axis=-1, keepdims=True)
    var = jnp.mean(jnp.square(h - mu), axis=-1, keepdims=True)
    h = (h - mu) * jax.lax.rsqrt(var + 1e-5) * p["gamma"] + p["beta"]
    h = jax.nn.gelu(h, approximate=False)
    w = h @ p["w2"] + p["b2"]
    w = jnp.where(mask.astype(jnp.float32)[:, :, None] == 0.0, -jnp.inf, w)
    w = jax.nn.softmax(w, axis=1)
    return jnp.sum(w * x, axis=1)


if __name__ == "__main__":
    key = jax.random.PRNGKey(0)
    kx, kp, kx2 = jax.random.split(key, 3)

    # ---------------- small-shape check (single grid point) ----------------
    B, S, H = 2, 8, 32
    x = jax.random.normal(kx, (B, S, H), dtype=jnp.float32)
    # deterministic mask: row 0 fully valid, row 1 has the last 3 tokens masked out
    mask = jnp.array([[1] * S, [1] * (S - 3) + [0] * 3], dtype=jnp.int32)

    mean_cfg = PoolingConfig(name="Meanpool", MeanPooling=True)
    mean_pool = Pooling(mean_cfg, H, kp)
    out_mean = jax.block_until_ready(mean_pool(x, mask))
    assert out_mean.shape == (B, H)
    assert jnp.allclose(out_mean, _mean_pool_ref(x, mask), atol=1e-5, rtol=1e-5)

    attn_cfg = PoolingConfig(name="Attention", AttentionPooling=True)
    attn_pool = Pooling(attn_cfg, H, kp)
    out_attn = jax.block_until_ready(attn_pool(x, mask))
    assert out_attn.shape == (B, H)
    assert jnp.allclose(out_attn, _attn_pool_ref(x, mask, attn_pool.params),
                        atol=1e-4, rtol=1e-4)

    cls_cfg = PoolingConfig(name="CLS")
    cls_pool = Pooling(cls_cfg, H, kp)
    out_cls = jax.block_until_ready(cls_pool(x, mask))
    assert jnp.allclose(out_cls, x[:, 0, :])

    # -------- multi-tile check: 2 sequence steps exercise the accumulator /
    # online-softmax carry, including a row whose first chunk is fully masked --------
    B2, S2, H2 = 4, 256, 128
    x2 = jax.random.normal(kx2, (B2, S2, H2), dtype=jnp.float32)
    idx = jnp.arange(S2)[None, :]
    starts = jnp.array([0, 0, 128, 0])[:, None]     # row 2: leading chunk fully masked
    ends = jnp.array([256, 156, 200, 1])[:, None]   # row 3: single valid token
    mask2 = ((idx >= starts) & (idx < ends)).astype(jnp.int32)

    mean_pool2 = Pooling(mean_cfg, H2, kp)
    out_mean2 = jax.block_until_ready(mean_pool2(x2, mask2, seq_block=128))
    assert jnp.allclose(out_mean2, _mean_pool_ref(x2, mask2), atol=1e-4, rtol=1e-4)

    attn_pool2 = Pooling(attn_cfg, H2, kp)
    out_attn2 = jax.block_until_ready(attn_pool2(x2, mask2, seq_block=128))
    assert jnp.allclose(out_attn2, _attn_pool_ref(x2, mask2, attn_pool2.params),
                        atol=1e-3, rtol=1e-3)

    print("KERNEL_OK")
</pallas_src>

<mosaic_0001>
module attributes {stable_mosaic.version = 11 : i64} {
  func.func @_meanpool_kernel(%arg0: i32, %arg1: i32, %arg2: memref<2x8x32xf32, #tpu.memory_space<vmem>>, %arg3: memref<2x8xi32, #tpu.memory_space<vmem>>, %arg4: memref<2x32xf32, #tpu.memory_space<vmem>>, %arg5: memref<2x1xf32, #tpu.memory_space<vmem>>) attributes {dimension_semantics = [#tpu.dimension_semantics<parallel>, #tpu.dimension_semantics<arbitrary>], iteration_bounds = array<i64: 1, 1>, scalar_prefetch = 0 : i64, scratch_operands = 1 : i64, tpu.core_type = #tpu.core_type<tc>, window_params = [{transform_indices = @transform_0, window_bounds = array<i64: 2, 8, 32>}, {transform_indices = @transform_1, window_bounds = array<i64: 2, 8>}, {transform_indices = @transform_2, window_bounds = array<i64: 2, 32>}]} {
    %c0_i32 = arith.constant 0 : i32
    %0 = arith.cmpi eq, %arg1, %c0_i32 : i32
    %1 = arith.extui %0 : i1 to i32
    %c0_i32_0 = arith.constant 0 : i32
    %2 = arith.cmpi ne, %1, %c0_i32_0 : i32
    scf.if %2 {
      %cst_18 = arith.constant 0.000000e+00 : f32
      %22 = vector.broadcast %cst_18 : f32 to vector<2x32xf32>
      %c0_19 = arith.constant 0 : index
      %c0_20 = arith.constant 0 : index
      %23 = vector.load %arg4[%c0_19, %c0_20] : memref<2x32xf32, #tpu.memory_space<vmem>>, vector<2x32xf32>
      tpu.vector_store %arg4[%c0_19, %c0_20], %22 {strides = array<i32>} : memref<2x32xf32, #tpu.memory_space<vmem>>, vector<2x32xf32>,
      %cst_21 = arith.constant 0.000000e+00 : f32
      %24 = vector.broadcast %cst_21 : f32 to vector<2x1xf32>
      %c0_22 = arith.constant 0 : index
      %c0_23 = arith.constant 0 : index
      %25 = vector.load %arg5[%c0_22, %c0_23] : memref<2x1xf32, #tpu.memory_space<vmem>>, vector<2x1xf32>
      tpu.vector_store %arg5[%c0_22, %c0_23], %24 {strides = array<i32>} : memref<2x1xf32, #tpu.memory_space<vmem>>, vector<2x1xf32>,
    } else {
    }
    %c0 = arith.constant 0 : index
    %c0_1 = arith.constant 0 : index
    %c0_2 = arith.constant 0 : index
    %3 = vector.load %arg2[%c0, %c0_1, %c0_2] : memref<2x8x32xf32, #tpu.memory_space<vmem>>, vector<2x8x32xf32>
    %c0_3 = arith.constant 0 : index
    %c0_4 = arith.constant 0 : index
    %4 = vector.load %arg3[%c0_3, %c0_4] : memref<2x8xi32, #tpu.memory_space<vmem>>, vector<2x8xi32>
    %5 = arith.sitofp %4 : vector<2x8xi32> to vector<2x8xf32>
    %c0_5 = arith.constant 0 : index
    %c0_6 = arith.constant 0 : index
    %6 = vector.load %arg4[%c0_5, %c0_6] : memref<2x32xf32, #tpu.memory_space<vmem>>, vector<2x32xf32>
    %7 = vector.shape_cast %5 : vector<2x8xf32> to vector<2x1x8xf32>
    "tpu.trace_start"() <{level = 10 : i32, message = "bqs,bsh->bqh"}> : () -> ()
    %cst = arith.constant dense<0.000000e+00> : vector<2x1x32xf32>
    %8 = tpu.matmul %7, %3, %cst {dimension_numbers = #tpu.dot_dimension_numbers<[2], [1], [1], [2], [0, 0, 0, 1, 1, 2], [0], [0]>} : vector<2x1x8xf32>, vector<2x8x32xf32>, vector<2x1x32xf32> -> vector<2x1x32xf32>
    "tpu.trace_stop"() : () -> ()
    %9 = vector.shape_cast %8 : vector<2x1x32xf32> to vector<2x32xf32>
    %10 = arith.addf %6, %9 : vector<2x32xf32>
    %c0_7 = arith.constant 0 : index
    %c0_8 = arith.constant 0 : index
    %11 = vector.load %arg4[%c0_7, %c0_8] : memref<2x32xf32, #tpu.memory_space<vmem>>, vector<2x32xf32>
    tpu.vector_store %arg4[%c0_7, %c0_8], %10 {strides = array<i32>} : memref<2x32xf32, #tpu.memory_space<vmem>>, vector<2x32xf32>,
    %c0_9 = arith.constant 0 : index
    %c0_10 = arith.constant 0 : index
    %12 = vector.load %arg5[%c0_9, %c0_10] : memref<2x1xf32, #tpu.memory_space<vmem>>, vector<2x1xf32>
    %c0_11 = arith.constant 0 : index
    %c0_12 = arith.constant 0 : index
    %13 = vector.load %arg3[%c0_11, %c0_12] : memref<2x8xi32, #tpu.memory_space<vmem>>, vector<2x8xi32>
    %14 = arith.sitofp %13 : vector<2x8xi32> to vector<2x8xf32>
    %cst_13 = arith.constant dense<0.000000e+00> : vector<2xf32>
    %15 = vector.multi_reduction <add>, %14, %cst_13 [1] : vector<2x8xf32> to vector<2xf32>
    %16 = vector.shape_cast %15 : vector<2xf32> to vector<2x1xf32>
    %17 = arith.addf %12, %16 : vector<2x1xf32>
    %c0_14 = arith.constant 0 : index
    %c0_15 = arith.constant 0 : index
    %18 = vector.load %arg5[%c0_14, %c0_15] : memref<2x1xf32, #tpu.memory_space<vmem>>, vector<2x1xf32>
    tpu.vector_store %arg5[%c0_14, %c0_15], %17 {strides = array<i32>} : memref<2x1xf32, #tpu.memory_space<vmem>>, vector<2x1xf32>,
    %c0_i32_16 = arith.constant 0 : i32
    %19 = arith.cmpi eq, %arg1, %c0_i32_16 : i32
    %20 = arith.extui %19 : i1 to i32
    %c0_i32_17 = arith.constant 0 : i32
    %21 = arith.cmpi ne, %20, %c0_i32_17 : i32
    scf.if %21 {
      %c0_18 = arith.constant 0 : index
      %c0_19 = arith.constant 0 : index
      %22 = vector.load %arg4[%c0_18, %c0_19] : memref<2x32xf32, #tpu.memory_space<vmem>>, vector<2x32xf32>
      %c0_20 = arith.constant 0 : index
      %c0_21 = arith.constant 0 : index
      %23 = vector.load %arg5[%c0_20, %c0_21] : memref<2x1xf32, #tpu.memory_space<vmem>>, vector<2x1xf32>
      %cst_22 = arith.constant 9.99999971E-10 : f32
      %24 = vector.broadcast %cst_22 : f32 to vector<2x1xf32>
      %25 = arith.maximumf %23, %24 : vector<2x1xf32>
      %26 = vector.broadcast %25 : vector<2x1xf32> to vector<2x32xf32>
      %27 = arith.divf %22, %26 : vector<2x32xf32>
      %c0_23 = arith.constant 0 : index
      %c0_24 = arith.constant 0 : index
      %28 = vector.load %arg4[%c0_23, %c0_24] : memref<2x32xf32, #tpu.memory_space<vmem>>, vector<2x32xf32>
      tpu.vector_store %arg4[%c0_23, %c0_24], %27 {strides = array<i32>} : memref<2x32xf32, #tpu.memory_space<vmem>>, vector<2x32xf32>,
    } else {
    }
    return
  }
  func.func @transform_0(%arg0: i32, %arg1: i32) -> (i32, i32, i32) {
    %c0_i32 = arith.constant 0 : i32
    %c0_i32_0 = arith.constant 0 : i32
    return %arg0, %arg1, %c0_i32 : i32, i32, i32
  }
  func.func @transform_1(%arg0: i32, %arg1: i32) -> (i32, i32) {
    %c0_i32 = arith.constant 0 : i32
    return %arg0, %arg1 : i32, i32
  }
  func.func @transform_2(%arg0: i32, %arg1: i32) -> (i32, i32) {
    %c0_i32 = arith.constant 0 : i32
    %c0_i32_0 = arith.constant 0 : i32
    return %arg0, %c0_i32 : i32, i32
  }
}

</mosaic_0001>

<bundles_post_ra>
// kernel: tpu_custom_call.1
= control target key start
LH: loop header
LB: loop body
LE: loop exit
PB: predicated region body
PF: predicated region fallthrough
CT: control target
= control target key end

     0   :  { %7 = vsyncpa [#allocation4], 0  ;;  %s292_s0 = inlined_call_operand.hbm [shape: f32[2,8,32], index: 0, kind: input, shape index: {}]   ;;  %s293_s1 = inlined_call_operand.hbm [shape: s32[2,8], index: 1, kind: input, shape index: {}]   ;;  %s294_s2 = inlined_call_operand.hbm [shape: f32[2,32], index: 2, kind: output, shape index: {}]  }
   0x1   :  { %8 = vsyncpa [#allocation7], 0 }
   0x2   :  { %9 = vsyncpa [#allocation5], 0  ;;  %s14_s11 = sshll.u32 %s292_s0, 4  ;;  %s256_s12 = smov [#allocation3]   ;;  %s15_s11 = int_to_ptr.hbm [resolvable:$true] %s14_s11 }
   0x3   :  { %s16_s13 = sshll.u32 %s256_s12, 4  ;;  %s28_s16 = sshll.u32 %s293_s1, 4  ;;  %s17_s13 = int_to_ptr.vmem [resolvable:$true] %s16_s13  ;;  %s29_s16 = int_to_ptr.hbm [resolvable:$true] %s28_s16 }
   0x4   :  { %s257_s17 = smov 128   ;;  %s258_s18 = smov 8  }
   0x5   :  { %22 = dma.hbm_to_vmem [thread:$0]  %s15_s11, 256, %s17_s13, [#allocation4], %s257_s17, %s257_s17, %s258_s18  }
   0x6   :  { %s259_s19 = smov [#allocation6]  }
   0x7   :  { %s30_s20 = sshll.u32 %s259_s19, 4  ;;  %s31_s20 = int_to_ptr.vmem [resolvable:$true] %s30_s20 }
   0x8   :  { %33 = dma.hbm_to_vmem [thread:$0]  %s29_s16, 32, %s31_s20, [#allocation7]  }
   0x9   :  { %250 = dma.done.wait [#allocation4], 256  }
   0xa   :  { %251 = vsyncadd [#allocation4], 4294967040 }
   0xb   :  { %252 = dma.done.wait [#allocation7], 32  }
   0xc   :  { %253 = vsyncadd [#allocation7], 4294967264  ;;  %vm48_vm0 = vcmask 1024   ;;  %v260_v0 = vmov 0.0   ;;  %v112_v1 = vld [vmem:[#allocation6] sm:$0x3] }
   0xd   :  { %49 = vst.msk [vmem:[#allocation2] sm:$0x3] %vm48_vm0, %v260_v0  ;;  %vm114_vm1 = vcmask 58368   ;;  %v113_v2 = vcvt.s32.f32 %v112_v1  ;;  %v52_v4 = vld [vmem:[#allocation6] sm:$0x3]  ;;  %v51_v6 = vld [vmem:[#allocation3 + $0x8] sm:$0xff] }
   0xe   :  { %v53_v5 = vcvt.s32.f32 %v52_v4  ;;  %vm57_vm2 = vcmask 64512   ;;  %v50_v7 = vld [vmem:[#allocation3] sm:$0xff]  ;;  %97 = vmatpush.msra.mxu1 %v51_v6  ;;  %v261_v9 = vmov 0   ;;  %vm46_vm3 = vcmask 254976   ;;  %s262_s0 = smov [#allocation8]   ;;  %s155_s23 = sshll.u32 %s294_s2, 4  ;;  %s156_s23 = int_to_ptr.hbm [resolvable:$true] %s155_s23 }
   0xf   :  { %v115_v3 = vsel %vm114_vm1, %v113_v2, 0.0  ;;  %75 = vmatpush.msra.mxu0 %v50_v7  ;;  %175 = vset.pattern.permute.xlu0 %v261_v9  ;;  %47 = vst.msk [vmem:[#allocation8] sm:$0x3] %vm46_vm3, %v260_v0  ;;  %vm105_vm4 = vcmask 1041409   ;;  %s153_s1 = sshll.u32 %s262_s0, 4  ;;  %s154_s1 = int_to_ptr.vmem [resolvable:$true] %s153_s1 }
  0x10   :  { %116 = vadd.xlane.f32.xlu0 %v115_v3  ;;  %v56_v8 = vrot.slane %v53_v5, 1  ;;  %166 = vmatmul.msk.f32.vlgmr.msra.gmra.mxu0 %vm57_vm2, %v53_v5 }
  0x12   :  { %167 = vmatmul.msk.f32.vlgmr.msra.gmra.mxu1 %vm57_vm2, %v56_v8 }
  0x14   :  { %v111_v10 = vld [vmem:[#allocation2] sm:$0x3] }
  0x16   :  { %v54_v18 = vld [vmem:[#allocation8] sm:$0x3] }
  0x83   :  { %v117_v11 = vpop.xlane.xlu0 %116 }
  0x84   :  { %v118_v12 = vadd.f32 %v117_v11, %v111_v10 }
  0x86   :  { %120 = vst.msk [vmem:[#allocation2] sm:$0x3] %vm48_vm0, %v118_v12 }
  0x8d   :  { %v125_v13 = vld [vmem:[#allocation2] sm:$0x3]  ;;  %v77_v17 = vpop.f32.mrf.mxu0 }
  0x8e   :  { %v126_v14 = vmax.f32 %v125_v13, 1e-09 }
  0x8f   :  { %v99_v15 = vpop.f32.mrf.mxu1 }
  0x90   :  { %129 = vperm.xlu0 %175, %v126_v14   ;;  %v104_v16 = vrot.slane %v99_v15, 7 }
  0x92   :  { %v106_v19 = vsel %vm105_vm4, %v104_v16, %v77_v17 }
  0x93   :  { %v108_v20 = vadd.f32 %v106_v19, %v54_v18 }
  0x95   :  { %110 = vst.msk [vmem:[#allocation8] sm:$0x3] %vm46_vm3, %v108_v20 }
  0x9c   :  { %v124_v30 = vld [vmem:[#allocation8] sm:$0x3] }
 0x102   :  { %v130_v21 = vpop.permute.xlu0 %129 }
 0x103   :  { %176 = vrcp.f32 %v130_v21  ;;  %v143_v25 = vand.u32 2147483648, %v130_v21  ;;  %v141_v27 = vand.u32 2147483647, %v130_v21  ;;  %vm137_vm6 = vweird.f32 %v130_v21 }
 0x105   :  { %v144_v29 = vor.u32 1.1754944e-38, %v143_v25  ;;  %vm142_vm8 = vcmp.eq.f32.partialorder %v141_v27, 8.507059e+37 }
 0x109   :  { %v177_v22 = vpop.eup %176 }
 0x10a   :  { %v133_v23 = vmul.f32 %v177_v22, %v130_v21  ;;  %vm138_vm5 = vweird.f32 %v177_v22 }
 0x10b   :  { %vm139_vm7 = vmor %vm137_vm6, %vm138_vm5 }
 0x10c   :  { %v134_v24 = vsub.f32 1.0, %v133_v23 }
 0x10e   :  { %v135_v26 = vmul.f32 %v177_v22, %v134_v24 }
 0x110   :  { %v136_v28 = vadd.f32 %v177_v22, %v135_v26 }
 0x112   :  { %v140_v31 = vsel %vm139_vm7, %v177_v22, %v136_v28 }
 0x113   :  { %v145_v32 = vsel %vm142_vm8, %v144_v29, %v140_v31 }
 0x114   :  { %v146_v33 = vmul.f32 %v145_v32, %v124_v30 }
 0x116   :  { %147 = vst.msk [vmem:[#allocation8] sm:$0x3] %vm46_vm3, %v146_v33 }
 0x117   :  { %158 = dma.vmem_to_hbm [thread:$0]  %s154_s1, 32, %s156_s23, [#allocation5]  }
 0x118   :  { %254 = dma.done.wait [#allocation5], 32  }
 0x119   :  { %255 = vsyncadd [#allocation5], 4294967264 }
 0x11a   :  { %163 = vsyncpa [#allocation4], 1 }
 0x11b   :  { %164 = vsyncpa [#allocation7], 1 }
 0x11c   :  { %165 = vsyncpa [#allocation5], 1 }

</bundles_post_ra>
